<compile_context>
chip_gen: v6e
topology: v6e:2x2x1
jax: 0.10.0
libtpu: 0.0.40
codegen_flags: <defaults>
</compile_context>

<pallas_src>
import functools

import jax
import jax.numpy as jnp
from jax import lax
from jax.experimental import pallas as pl
from jax.experimental.pallas import tpu as pltpu

_MIB = 1024 * 1024


# ---------------------------------------------------------------------------
# VMEM budgets (generation aware).
# ---------------------------------------------------------------------------
def _vmem_capacity_bytes():
    """Physical per-core VMEM (128 MiB v5e/v6e, 64 MiB v7x); conservative fallback."""
    try:
        cap = int(pltpu.get_tpu_info().vmem_capacity_bytes)
        if cap >= 32 * _MIB:
            return cap
    except Exception:
        pass
    return 64 * _MIB  # safe on every generation


def _vmem_budgets():
    cap = _vmem_capacity_bytes()
    vmem_limit = (cap * 3) // 4    # handed to Mosaic: 96 MiB on v5e/v6e, 48 MiB on v7x
    slab_budget = (cap * 5) // 8   # what our own blocks may use: 80 / 40 MiB
    return vmem_limit, slab_budget


# ---------------------------------------------------------------------------
# Fused path: one grid step per batch-pack, whole (Bb, C, HWp) slabs in VMEM.
# ---------------------------------------------------------------------------
def _fused_kernel(x_ref, y_ref, w1_ref, b1_ref, w2_ref, b2_ref, o_ref, *, inv_hw):
    # x/y/o: (Bb, C, HWp) f32.  w1: (Cr, C)  b1: (1, Cr)  w2: (C, Cr)  b2: (C, 1)
    x = x_ref[...]
    y = y_ref[...]

    # Spatial mean over the lane axis. mean(x+y) == mean(x)+mean(y) (no x+y temp);
    # padded lanes are zero, and we scale by 1/true_HW, so this is exact.
    m = (jnp.sum(x, axis=2) + jnp.sum(y, axis=2)) * inv_hw                  # (Bb, C)

    # Tiny fc1/fc2 gate on the VPU/XLU: broadcast-multiply + lane-axis reductions
    # only (exact f32; MXU left idle — it is never the bottleneck here).
    h = jnp.sum(w1_ref[...][None] * m[:, None, :], axis=2) + b1_ref[...]    # (Bb, Cr)
    g = jnp.sum(w2_ref[...][None] * h[:, None, :], axis=2, keepdims=True)   # (Bb, C, 1)
    gate = jax.nn.sigmoid(g + b2_ref[...])                                  # (Bb, C, 1)

    o_ref[...] = y + gate * (x - y)                                         # == x*g + y*(1-g)


# ---------------------------------------------------------------------------
# Decoupled path, pass 1: pure partial sums of x + y over one (b, C-tile, HW-tile).
# All grid axes are parallel (no accumulator, no ordering requirement).
# ---------------------------------------------------------------------------
def _gate_sum_kernel(x_ref, y_ref, s_ref):
    # x/y: (1, Ct, Tg)   s: (1, 1, Ct, 1)
    s_ref[0, 0] = (jnp.sum(x_ref[0], axis=1, keepdims=True) +
                   jnp.sum(y_ref[0], axis=1, keepdims=True))                # (Ct, 1)


# ---------------------------------------------------------------------------
# Decoupled path, pass 2: lane-dense tiled blend.
# ---------------------------------------------------------------------------
def _blend_kernel(g_ref, x_ref, y_ref, o_ref):
    gate = g_ref[0]                          # (Ct, 1)
    x = x_ref[0]                             # (Ct, Tb)
    y = y_ref[0]                             # (Ct, Tb)
    o_ref[0] = y + gate * (x - y)            # == x*g + y*(1-g)


# ---------------------------------------------------------------------------
# Tile selection helpers.
# ---------------------------------------------------------------------------
def _largest_divisor_leq(n, step, limit):
    """Largest multiple-of-`step` divisor of n that is <= limit (None if none)."""
    best = None
    t = step
    hi = min(n, limit)
    while t <= hi:
        if n % t == 0:
            best = t
        t += step
    return best


def _pick_c_tile(c, max_ct=256):
    """Channel tile: full C if small, else a multiple-of-8 divisor of C."""
    if c <= max_ct:
        return c
    ct = _largest_divisor_leq(c, 8, max_ct)
    return ct if ct is not None else c


def _pick_hw_tile(hwp, ct, n_streams, budget_bytes):
    """Largest multiple-of-128 divisor of hwp whose double-buffered blocks fit."""
    per_buf_cap = min(budget_bytes // (n_streams * 2), 6 * _MIB)
    max_t = max(128, per_buf_cap // max(1, ct * 4))
    t = _largest_divisor_leq(hwp, 128, max_t)
    return t if t is not None else hwp


def _pick_batch_tile(b, per_batch_bytes, tmp_per_batch_bytes, budget_bytes):
    """Largest divisor of B whose fused working set (6 DB blocks + ~2 temps) fits."""
    best = 0
    for cand in range(1, b + 1):
        if b % cand:
            continue
        if 8 * cand * per_batch_bytes > budget_bytes:
            break
        if cand > 1 and cand * tmp_per_batch_bytes > 4 * _MIB:
            continue
        best = cand
    return best


# ---------------------------------------------------------------------------
# Wrapper.
# ---------------------------------------------------------------------------
def multimodal_fusion(x_nchw, y_nchw, w1, b1, w2, b2, *,
                      force_decoupled=False, c_tile=None,
                      hw_tile=None, gate_hw_tile=None):
    """MultiModalFusion forward.

    x_nchw, y_nchw: [B, C, H, W] f32
    w1: fc1.weight [Cr, C]; b1: fc1.bias [Cr]; w2: fc2.weight [C, Cr]; b2: fc2.bias [C]
    """
    B, C, H, W = x_nchw.shape
    Cr = w1.shape[0]
    HW = H * W
    HWp = ((HW + 127) // 128) * 128
    inv_hw = 1.0 / float(HW)

    vmem_limit, slab_budget = _vmem_budgets()

    # Layout: reshape only (channels on sublanes, spatial on the lane axis).
    # Zero-pad the spatial axis to a multiple of 128 -> lane-dense, unmasked stores.
    x = x_nchw.reshape(B, C, HW)
    y = y_nchw.reshape(B, C, HW)
    if HWp != HW:
        pad = ((0, 0), (0, 0), (0, HWp - HW))
        x = jnp.pad(x, pad)
        y = jnp.pad(y, pad)

    b1r = b1.reshape(1, Cr)
    b2c = b2.reshape(C, 1)

    w_bytes = 4 * 2 * (2 * C * Cr + C + Cr)      # double-buffered weights/biases
    per_batch = C * HWp * 4                      # one stream's per-batch slab
    tmp_per_batch = 2 * C * Cr * 4               # tiny gate temporaries per batch
    bb = 0 if force_decoupled else _pick_batch_tile(
        B, per_batch, tmp_per_batch, max(0, slab_budget - w_bytes))

    if bb >= 1:
        # ----- fused single-pass path (3 HBM streams) -----
        out = pl.pallas_call(
            functools.partial(_fused_kernel, inv_hw=inv_hw),
            out_shape=jax.ShapeDtypeStruct((B, C, HWp), jnp.float32),
            grid_spec=pltpu.PrefetchScalarGridSpec(
                num_scalar_prefetch=0,
                grid=(B // bb,),
                in_specs=[
                    pl.BlockSpec((bb, C, HWp), lambda i: (i, 0, 0)),   # x
                    pl.BlockSpec((bb, C, HWp), lambda i: (i, 0, 0)),   # y
                    pl.BlockSpec((Cr, C), lambda i: (0, 0)),           # fc1.weight
                    pl.BlockSpec((1, Cr), lambda i: (0, 0)),           # fc1.bias
                    pl.BlockSpec((C, Cr), lambda i: (0, 0)),           # fc2.weight
                    pl.BlockSpec((C, 1), lambda i: (0, 0)),            # fc2.bias
                ],
                out_specs=pl.BlockSpec((bb, C, HWp), lambda i: (i, 0, 0)),
            ),
            compiler_params=pltpu.CompilerParams(
                dimension_semantics=("parallel",),
                vmem_limit_bytes=int(vmem_limit)),
        )(x, y, w1, b1r, w2, b2c)
        if HWp != HW:
            out = out[:, :, :HW]
        return out.reshape(B, C, H, W)

    # ----- decoupled path (large feature maps): gate-sum pass + blend pass -----
    Ct = c_tile if c_tile is not None else _pick_c_tile(C)
    assert C % Ct == 0 and (Ct % 8 == 0 or Ct == C), "bad channel tile"
    n_c = C // Ct

    Tg = gate_hw_tile if gate_hw_tile is not None else _pick_hw_tile(HWp, Ct, 2, slab_budget)
    Tb = hw_tile if hw_tile is not None else _pick_hw_tile(HWp, Ct, 3, slab_budget)
    assert Tg % 128 == 0 and HWp % Tg == 0, "bad gate hw tile"
    assert Tb % 128 == 0 and HWp % Tb == 0, "bad blend hw tile"
    n_tg = HWp // Tg
    n_tb = HWp // Tb

    # Pass 1: per-(batch, C-tile, HW-tile) partial sums; every grid axis parallel.
    partial = pl.pallas_call(
        _gate_sum_kernel,
        out_shape=jax.ShapeDtypeStruct((B, n_tg, C, 1), jnp.float32),
        grid_spec=pltpu.PrefetchScalarGridSpec(
            num_scalar_prefetch=0,
            grid=(B, n_c, n_tg),
            in_specs=[
                pl.BlockSpec((1, Ct, Tg), lambda b, c, t: (b, c, t)),   # x
                pl.BlockSpec((1, Ct, Tg), lambda b, c, t: (b, c, t)),   # y
            ],
            out_specs=pl.BlockSpec((1, 1, Ct, 1), lambda b, c, t: (b, t, c, 0)),
        ),
        compiler_params=pltpu.CompilerParams(
            dimension_semantics=("parallel", "parallel", "parallel"),
            vmem_limit_bytes=int(vmem_limit)),
    )(x, y)

    # Tiny (B, C) gate math in plain XLA (a few KB of work; exact f32 precision).
    m = jnp.sum(partial[..., 0], axis=1) * inv_hw                            # (B, C)
    h = jnp.einsum("bc,rc->br", m, w1, precision=lax.Precision.HIGHEST) + b1
    g = jax.nn.sigmoid(
        jnp.einsum("br,cr->bc", h, w2, precision=lax.Precision.HIGHEST) + b2)
    gate = g[:, :, None]                                                     # (B, C, 1)

    # Pass 2: lane-dense tiled blend; all grid axes parallel (megacore / 2-TC friendly).
    out = pl.pallas_call(
        _blend_kernel,
        out_shape=jax.ShapeDtypeStruct((B, C, HWp), jnp.float32),
        grid_spec=pltpu.PrefetchScalarGridSpec(
            num_scalar_prefetch=0,
            grid=(B, n_c, n_tb),
            in_specs=[
                pl.BlockSpec((1, Ct, 1), lambda b, c, t: (b, c, 0)),     # gate
                pl.BlockSpec((1, Ct, Tb), lambda b, c, t: (b, c, t)),    # x
                pl.BlockSpec((1, Ct, Tb), lambda b, c, t: (b, c, t)),    # y
            ],
            out_specs=pl.BlockSpec((1, Ct, Tb), lambda b, c, t: (b, c, t)),
        ),
        compiler_params=pltpu.CompilerParams(
            dimension_semantics=("parallel", "parallel", "parallel"),
            vmem_limit_bytes=int(vmem_limit)),
    )(gate, x, y)
    if HWp != HW:
        out = out[:, :, :HW]
    return out.reshape(B, C, H, W)


# ---------------------------------------------------------------------------
# Pure-JAX reference (matches PyTorch MultiModalFusion.forward).
# ---------------------------------------------------------------------------
def _reference(x, y, w1, b1, w2, b2):
    m = (x + y).mean(axis=(2, 3))                                            # (B, C)
    h = jnp.einsum("bc,rc->br", m, w1, precision=lax.Precision.HIGHEST) + b1
    g = jax.nn.sigmoid(
        jnp.einsum("br,cr->bc", h, w2, precision=lax.Precision.HIGHEST) + b2)
    g = g[:, :, None, None]
    return x * g + y * (1.0 - g)


if __name__ == "__main__":
    key = jax.random.PRNGKey(0)
    B, dim, H, W = 2, 32, 16, 16
    reduction = 8
    Cr = dim // reduction

    k_x, k_y, k_w1, k_b1, k_w2, k_b2 = jax.random.split(key, 6)
    x = jax.random.normal(k_x, (B, dim, H, W), dtype=jnp.float32)
    y = jax.random.normal(k_y, (B, dim, H, W), dtype=jnp.float32)

    # PyTorch nn.Linear default init: U(-1/sqrt(fan_in), 1/sqrt(fan_in)),
    # weights kept in PyTorch's natural (out_features, in_features) layout.
    bound1 = 1.0 / (dim ** 0.5)
    w1 = jax.random.uniform(k_w1, (Cr, dim), jnp.float32, -bound1, bound1)
    b1 = jax.random.uniform(k_b1, (Cr,), jnp.float32, -bound1, bound1)
    bound2 = 1.0 / (Cr ** 0.5)
    w2 = jax.random.uniform(k_w2, (dim, Cr), jnp.float32, -bound2, bound2)
    b2 = jax.random.uniform(k_b2, (dim,), jnp.float32, -bound2, bound2)

    # 1) Fused single-pass path (auto-selected; exercises batch packing Bb=B).
    out_fused = multimodal_fusion(x, y, w1, b1, w2, b2)
    # 2) Decoupled path (forced), exercising C-tiling and multiple HW tiles.
    out_tiled = multimodal_fusion(x, y, w1, b1, w2, b2,
                                  force_decoupled=True,
                                  c_tile=16, hw_tile=128, gate_hw_tile=128)
    out_fused, out_tiled = jax.block_until_ready((out_fused, out_tiled))

    ref = _reference(x, y, w1, b1, w2, b2)
    assert out_fused.shape == (B, dim, H, W)
    assert jnp.allclose(out_fused, ref, atol=2e-5, rtol=2e-5)
    assert jnp.allclose(out_tiled, ref, atol=2e-5, rtol=2e-5)

    # 3) Non-multiple-of-128 spatial size: exercises the zero-padding path.
    Hs, Ws = 10, 10
    xs = jax.random.normal(jax.random.PRNGKey(1), (B, dim, Hs, Ws), jnp.float32)
    ys = jax.random.normal(jax.random.PRNGKey(2), (B, dim, Hs, Ws), jnp.float32)
    out_pad = jax.block_until_ready(multimodal_fusion(xs, ys, w1, b1, w2, b2))
    ref_pad = _reference(xs, ys, w1, b1, w2, b2)
    assert out_pad.shape == (B, dim, Hs, Ws)
    assert jnp.allclose(out_pad, ref_pad, atol=2e-5, rtol=2e-5)

    print("KERNEL_OK")
</pallas_src>

<mosaic_0001>
module attributes {stable_mosaic.version = 11 : i64} {
  func.func @_fused_kernel(%arg0: i32, %arg1: memref<2x32x256xf32, #tpu.memory_space<vmem>>, %arg2: memref<2x32x256xf32, #tpu.memory_space<vmem>>, %arg3: memref<4x32xf32, #tpu.memory_space<vmem>>, %arg4: memref<1x4xf32, #tpu.memory_space<vmem>>, %arg5: memref<32x4xf32, #tpu.memory_space<vmem>>, %arg6: memref<32x1xf32, #tpu.memory_space<vmem>>, %arg7: memref<2x32x256xf32, #tpu.memory_space<vmem>>) attributes {dimension_semantics = [#tpu.dimension_semantics<parallel>], iteration_bounds = array<i64: 1>, scalar_prefetch = 0 : i64, scratch_operands = 0 : i64, tpu.core_type = #tpu.core_type<tc>, window_params = [{transform_indices = @transform_0, window_bounds = array<i64: 2, 32, 256>}, {transform_indices = @transform_1, window_bounds = array<i64: 2, 32, 256>}, {pipeline_mode = #tpu.pipeline_mode<synchronous>, transform_indices = @transform_2, window_bounds = array<i64: 4, 32>}, {pipeline_mode = #tpu.pipeline_mode<synchronous>, transform_indices = @transform_3, window_bounds = array<i64: 1, 4>}, {pipeline_mode = #tpu.pipeline_mode<synchronous>, transform_indices = @transform_4, window_bounds = array<i64: 32, 4>}, {pipeline_mode = #tpu.pipeline_mode<synchronous>, transform_indices = @transform_5, window_bounds = array<i64: 32, 1>}, {transform_indices = @transform_6, window_bounds = array<i64: 2, 32, 256>}]} {
    %c0 = arith.constant 0 : index
    %c0_0 = arith.constant 0 : index
    %c0_1 = arith.constant 0 : index
    %0 = vector.load %arg1[%c0, %c0_0, %c0_1] : memref<2x32x256xf32, #tpu.memory_space<vmem>>, vector<2x32x256xf32>
    %c0_2 = arith.constant 0 : index
    %c0_3 = arith.constant 0 : index
    %c0_4 = arith.constant 0 : index
    %1 = vector.load %arg2[%c0_2, %c0_3, %c0_4] : memref<2x32x256xf32, #tpu.memory_space<vmem>>, vector<2x32x256xf32>
    %cst = arith.constant dense<0.000000e+00> : vector<2x32xf32>
    %2 = vector.multi_reduction <add>, %0, %cst [2] : vector<2x32x256xf32> to vector<2x32xf32>
    %cst_5 = arith.constant dense<0.000000e+00> : vector<2x32xf32>
    %3 = vector.multi_reduction <add>, %1, %cst_5 [2] : vector<2x32x256xf32> to vector<2x32xf32>
    %4 = arith.addf %2, %3 : vector<2x32xf32>
    %cst_6 = arith.constant 3.906250e-03 : f32
    %5 = vector.broadcast %cst_6 : f32 to vector<2x32xf32>
    %6 = arith.mulf %4, %5 : vector<2x32xf32>
    %c0_7 = arith.constant 0 : index
    %c0_8 = arith.constant 0 : index
    %7 = vector.load %arg3[%c0_7, %c0_8] : memref<4x32xf32, #tpu.memory_space<vmem>>, vector<4x32xf32>
    %8 = vector.shape_cast %7 : vector<4x32xf32> to vector<1x4x32xf32>
    %9 = vector.shape_cast %6 : vector<2x32xf32> to vector<2x1x32xf32>
    %10 = vector.broadcast %8 : vector<1x4x32xf32> to vector<2x4x32xf32>
    %11 = vector.broadcast %9 : vector<2x1x32xf32> to vector<2x4x32xf32>
    %12 = arith.mulf %10, %11 : vector<2x4x32xf32>
    %cst_9 = arith.constant dense<0.000000e+00> : vector<2x4xf32>
    %13 = vector.multi_reduction <add>, %12, %cst_9 [2] : vector<2x4x32xf32> to vector<2x4xf32>
    %c0_10 = arith.constant 0 : index
    %c0_11 = arith.constant 0 : index
    %14 = vector.load %arg4[%c0_10, %c0_11] : memref<1x4xf32, #tpu.memory_space<vmem>>, vector<1x4xf32>
    %15 = vector.broadcast %14 : vector<1x4xf32> to vector<2x4xf32>
    %16 = arith.addf %13, %15 : vector<2x4xf32>
    %c0_12 = arith.constant 0 : index
    %c0_13 = arith.constant 0 : index
    %17 = vector.load %arg5[%c0_12, %c0_13] : memref<32x4xf32, #tpu.memory_space<vmem>>, vector<32x4xf32>
    %18 = vector.shape_cast %17 : vector<32x4xf32> to vector<1x32x4xf32>
    %19 = vector.shape_cast %16 : vector<2x4xf32> to vector<2x1x4xf32>
    %20 = vector.broadcast %18 : vector<1x32x4xf32> to vector<2x32x4xf32>
    %21 = vector.broadcast %19 : vector<2x1x4xf32> to vector<2x32x4xf32>
    %22 = arith.mulf %20, %21 : vector<2x32x4xf32>
    %cst_14 = arith.constant dense<0.000000e+00> : vector<2x32xf32>
    %23 = vector.multi_reduction <add>, %22, %cst_14 [2] : vector<2x32x4xf32> to vector<2x32xf32>
    %24 = vector.shape_cast %23 : vector<2x32xf32> to vector<2x32x1xf32>
    %c0_15 = arith.constant 0 : index
    %c0_16 = arith.constant 0 : index
    %25 = vector.load %arg6[%c0_15, %c0_16] : memref<32x1xf32, #tpu.memory_space<vmem>>, vector<32x1xf32>
    %26 = vector.shape_cast %25 : vector<32x1xf32> to vector<1x32x1xf32>
    %27 = vector.broadcast %26 : vector<1x32x1xf32> to vector<2x32x1xf32>
    %28 = arith.addf %24, %27 : vector<2x32x1xf32>
    %29 = arith.negf %28 : vector<2x32x1xf32>
    %30 = math.exp %29 : vector<2x32x1xf32>
    %cst_17 = arith.constant 1.000000e+00 : f32
    %31 = vector.broadcast %cst_17 : f32 to vector<2x32x1xf32>
    %32 = arith.addf %31, %30 : vector<2x32x1xf32>
    %33 = arith.divf %31, %32 : vector<2x32x1xf32>
    %34 = arith.subf %0, %1 : vector<2x32x256xf32>
    %35 = vector.broadcast %33 : vector<2x32x1xf32> to vector<2x32x256xf32>
    %36 = arith.mulf %35, %34 : vector<2x32x256xf32>
    %37 = arith.addf %1, %36 : vector<2x32x256xf32>
    %c0_18 = arith.constant 0 : index
    %c0_19 = arith.constant 0 : index
    %c0_20 = arith.constant 0 : index
    %38 = vector.load %arg7[%c0_18, %c0_19, %c0_20] : memref<2x32x256xf32, #tpu.memory_space<vmem>>, vector<2x32x256xf32>
    tpu.vector_store %arg7[%c0_18, %c0_19, %c0_20], %37 {strides = array<i32>} : memref<2x32x256xf32, #tpu.memory_space<vmem>>, vector<2x32x256xf32>,
    return
  }
  func.func @transform_0(%arg0: i32) -> (i32, i32, i32) {
    %c0_i32 = arith.constant 0 : i32
    %c0_i32_0 = arith.constant 0 : i32
    %c0_i32_1 = arith.constant 0 : i32
    return %arg0, %c0_i32, %c0_i32_0 : i32, i32, i32
  }
  func.func @transform_1(%arg0: i32) -> (i32, i32, i32) {
    %c0_i32 = arith.constant 0 : i32
    %c0_i32_0 = arith.constant 0 : i32
    %c0_i32_1 = arith.constant 0 : i32
    return %arg0, %c0_i32, %c0_i32_0 : i32, i32, i32
  }
  func.func @transform_2(%arg0: i32) -> (i32, i32) {
    %c0_i32 = arith.constant 0 : i32
    %c0_i32_0 = arith.constant 0 : i32
    %c0_i32_1 = arith.constant 0 : i32
    return %c0_i32, %c0_i32_0 : i32, i32
  }
  func.func @transform_3(%arg0: i32) -> (i32, i32) {
    %c0_i32 = arith.constant 0 : i32
    %c0_i32_0 = arith.constant 0 : i32
    %c0_i32_1 = arith.constant 0 : i32
    return %c0_i32, %c0_i32_0 : i32, i32
  }
  func.func @transform_4(%arg0: i32) -> (i32, i32) {
    %c0_i32 = arith.constant 0 : i32
    %c0_i32_0 = arith.constant 0 : i32
    %c0_i32_1 = arith.constant 0 : i32
    return %c0_i32, %c0_i32_0 : i32, i32
  }
  func.func @transform_5(%arg0: i32) -> (i32, i32) {
    %c0_i32 = arith.constant 0 : i32
    %c0_i32_0 = arith.constant 0 : i32
    %c0_i32_1 = arith.constant 0 : i32
    return %c0_i32, %c0_i32_0 : i32, i32
  }
  func.func @transform_6(%arg0: i32) -> (i32, i32, i32) {
    %c0_i32 = arith.constant 0 : i32
    %c0_i32_0 = arith.constant 0 : i32
    %c0_i32_1 = arith.constant 0 : i32
    return %arg0, %c0_i32, %c0_i32_0 : i32, i32, i32
  }
}

</mosaic_0001>

<bundles_post_ra>
// kernel: tpu_custom_call.1
= control target key start
LH: loop header
LB: loop body
LE: loop exit
PB: predicated region body
PF: predicated region fallthrough
CT: control target
= control target key end

     0   :  { %11 = vsyncpa [#allocation3], 0  ;;  %s847_s0 = inlined_call_operand.hbm [shape: f32[2,32,256], index: 0, kind: input, shape index: {}]   ;;  %s848_s1 = inlined_call_operand.hbm [shape: f32[2,32,256], index: 1, kind: input, shape index: {}]   ;;  %s849_s2 = inlined_call_operand.vmem [shape: f32[4,32], index: 2, kind: input, shape index: {}]   ;;  %s850_s3 = inlined_call_operand.vmem [shape: f32[1,4], index: 3, kind: input, shape index: {}]   ;;  %s851_s4 = inlined_call_operand.vmem [shape: f32[32,4], index: 4, kind: input, shape index: {}]   ;;  %s852_s5 = inlined_call_operand.vmem [shape: f32[32,1], index: 5, kind: input, shape index: {}]   ;;  %s853_s6 = inlined_call_operand.hbm [shape: f32[2,32,256], index: 6, kind: output, shape index: {}]  }
   0x1   :  { %12 = vsyncpa [#allocation6], 0 }
   0x2   :  { %13 = vsyncpa [#allocation4], 0  ;;  %s600_s21 = smov [#allocation2]  }
   0x3   :  { %s19_s22 = sshll.u32 %s600_s21, 4  ;;  %s20_s22 = int_to_ptr.vmem [resolvable:$true] %s19_s22 }
   0x4   :  { %s542_s23 = scalar_lea.vmem %s20_s22, 2048  ;;  %p547_p1 = scmp.lt.s32.totalorder %s20_s22, %s20_s22 }
   0x5   :  { %p543_p0 = scmp.ne.s32.totalorder %s20_s22, %s542_s23  ;;  %p548_p2 = scmp.lt.s32.totalorder %s542_s23, %s542_s23 }
   0x7   :  { %p549_p3 = por %p548_p2, %p547_p1 }
   0x9   :  { %p550_p4 = pnand %p549_p3, %p543_p0 }
   0xb   :  { %553 = shalt.err (!%p550_p4)
}
   0xc   :  { %s601_s24 = smov 256   ;;  %s602_s25 = smov 16  }
   0xd   :  { %25 = dma.hbm_to_vmem [thread:$0]  %s847_s0, 2048, %s20_s22, [#allocation3], %s601_s24, %s601_s24, %s602_s25  }
   0xe   :  { %s603_s28 = smov [#allocation5]  }
   0xf   :  { %s31_s29 = sshll.u32 %s603_s28, 4  ;;  %s32_s29 = int_to_ptr.vmem [resolvable:$true] %s31_s29 }
  0x10   :  { %s562_s30 = scalar_lea.vmem %s32_s29, 2048  ;;  %p567_p6 = scmp.lt.s32.totalorder %s32_s29, %s32_s29 }
  0x11   :  { %p563_p5 = scmp.ne.s32.totalorder %s32_s29, %s562_s30  ;;  %p568_p7 = scmp.lt.s32.totalorder %s562_s30, %s562_s30 }
  0x13   :  { %p569_p8 = por %p568_p7, %p567_p6 }
  0x15   :  { %p570_p9 = pnand %p569_p8, %p563_p5 }
  0x17   :  { %573 = shalt.err (!%p570_p9)
}
  0x18   :  { %37 = dma.hbm_to_vmem [thread:$0]  %s848_s1, 2048, %s32_s29, [#allocation6], %s601_s24, %s601_s24, %s602_s25  }
  0x19   :  { %594 = dma.done.wait [#allocation3], 2048  }
  0x1a   :  { %595 = vsyncadd [#allocation3], 4294965248 }
  0x1b   :  { %596 = dma.done.wait [#allocation6], 2048  }
  0x1c   :  { %597 = vsyncadd [#allocation6], 4294965248  ;;  %v653_v0 = vld [vmem:[#allocation2 + $0x40] sm:$0xff]  ;;  %v655_v1 = vld [vmem:[#allocation2 + $0x48] sm:$0xff]  ;;  %v157_v54 = vlaneseq  ;;  %vm168_vm0 = vcmask 130112   ;;  %vm175_vm1 = vcmask 195712  }
  0x1d   :  { %v96_v2 = vadd.f32 %v655_v1, %v653_v0  ;;  %v659_v3 = vld [vmem:[#allocation2] sm:$0xff]  ;;  %v661_v4 = vld [vmem:[#allocation2 + $0x8] sm:$0xff]  ;;  %v665_v6 = vld [vmem:[#allocation2 + $0x50] sm:$0xff]  ;;  %vm182_vm2 = vcmask 261312   ;;  %vm213_vm3 = vcmask 257024   ;;  %vm278_vm4 = vcmask 31744  }
  0x1e   :  { %v84_v5 = vadd.f32 %v661_v4, %v659_v3  ;;  %v667_v7 = vld [vmem:[#allocation2 + $0x58] sm:$0xff]  ;;  %v671_v9 = vld [vmem:[#allocation2 + $0x10] sm:$0xff]  ;;  %v677_v12 = vld [vmem:[#allocation5] sm:$0xff]  ;;  %v158_v57 = vand.u32 127, %v157_v54  ;;  %v160_v60 = vshrl.u32 %v157_v54, 7 }
  0x1f   :  { %97 = vadd.xlane.f32.xlu1 %v96_v2  ;;  %v99_v8 = vadd.f32 %v667_v7, %v665_v6  ;;  %v673_v10 = vld [vmem:[#allocation2 + $0x18] sm:$0xff]  ;;  %v675_v11 = vld [vmem:[#allocation5 + $0x10] sm:$0xff]  ;;  %v679_v13 = vld [vmem:[#allocation5 + $0x8] sm:$0xff] }
  0x20   :  { %85 = vadd.xlane.f32.xlu0 %v84_v5  ;;  %v87_v14 = vadd.f32 %v673_v10, %v671_v9  ;;  %v683_v15 = vld [vmem:[#allocation5 + $0x18] sm:$0xff]  ;;  %v687_v17 = vld [vmem:[#allocation5 + $0x50] sm:$0xff]  ;;  %v108_v19 = vadd.f32 %v679_v13, %v677_v12  ;;  %v693_v20 = vld [vmem:[#allocation5 + $0x40] sm:$0xff]  ;;  %v163_v61 = vadd.s32 4294967288, %v158_v57 }
  0x21   :  { %v111_v16 = vadd.f32 %v683_v15, %v675_v11  ;;  %v689_v18 = vld [vmem:[#allocation5 + $0x58] sm:$0xff]  ;;  %v695_v21 = vld [vmem:[#allocation5 + $0x48] sm:$0xff]  ;;  %v701_v24 = vld [vmem:[#allocation2 + $0x60] sm:$0xff] }
  0x22   :  { %v123_v22 = vadd.f32 %v689_v18, %v687_v17  ;;  %v120_v23 = vadd.f32 %v695_v21, %v693_v20  ;;  %v703_v25 = vld [vmem:[#allocation2 + $0x68] sm:$0xff]  ;;  %v705_v26 = vld [vmem:[#allocation2 + $0x20] sm:$0xff]  ;;  %v725_v36 = vld [vmem:[#allocation2 + $0x70] sm:$0xff] }
  0x23   :  { %100 = vadd.xlane.f32.xlu1 %v99_v8  ;;  %v707_v27 = vld [vmem:[#allocation2 + $0x28] sm:$0xff]  ;;  %v102_v28 = vadd.f32 %v703_v25, %v701_v24  ;;  %v711_v29 = vld [vmem:[#allocation5 + $0x60] sm:$0xff]  ;;  %v727_v37 = vld [vmem:[#allocation2 + $0x78] sm:$0xff] }
  0x24   :  { %88 = vadd.xlane.f32.xlu0 %v87_v14  ;;  %v713_v30 = vld [vmem:[#allocation5 + $0x68] sm:$0xff]  ;;  %v90_v31 = vadd.f32 %v707_v27, %v705_v26  ;;  %v717_v32 = vld [vmem:[#allocation5 + $0x20] sm:$0xff]  ;;  %855 = vst [vmem:[#allocation11_spill] sm:$0xff] %v727_v37  ;;  %v729_v38 = vld [vmem:[#allocation2 + $0x30] sm:$0xff]  ;;  %v105_v40 = vadd.f32 %v727_v37, %v725_v36 }
  0x25   :  { %v719_v33 = vld [vmem:[#allocation5 + $0x28] sm:$0xff]  ;;  %v126_v34 = vadd.f32 %v713_v30, %v711_v29  ;;  %v731_v39 = vld [vmem:[#allocation2 + $0x38] sm:$0xff]  ;;  %v737_v42 = vld [vmem:[#allocation5 + $0x70] sm:$0xff] }
  0x26   :  { %v114_v35 = vadd.f32 %v719_v33, %v717_v32  ;;  %v93_v41 = vadd.f32 %v731_v39, %v729_v38  ;;  %v739_v43 = vld [vmem:[#allocation5 + $0x78] sm:$0xff]  ;;  %v741_v44 = vld [vmem:[#allocation5 + $0x30] sm:$0xff] }
  0x27   :  { %112 = vadd.xlane.f32.xlu1 %v111_v16  ;;  %v743_v45 = vld [vmem:[#allocation5 + $0x38] sm:$0xff]  ;;  %v129_v46 = vadd.f32 %v739_v43, %v737_v42  ;;  %v170_v16 = vadd.s32 4294967280, %v158_v57 }
  0x28   :  { %109 = vadd.xlane.f32.xlu0 %v108_v19  ;;  %v117_v47 = vadd.f32 %v743_v45, %v741_v44 }
  0x29   :  { %v173_v54 = vsub.s32 %v170_v16, %v160_v60 }
  0x2b   :  { %124 = vadd.xlane.f32.xlu1 %v123_v22 }
  0x2c   :  { %121 = vadd.xlane.f32.xlu0 %v120_v23  ;;  %v166_v23 = vsub.s32 %v163_v61, %v160_v60 }
  0x2f   :  { %103 = vadd.xlane.f32.xlu1 %v102_v28 }
  0x30   :  { %91 = vadd.xlane.f32.xlu0 %v90_v31  ;;  %v749_v31 = vsub.s32 %v158_v57, %v160_v60 }
  0x33   :  { %127 = vadd.xlane.f32.xlu1 %v126_v34 }
  0x34   :  { %115 = vadd.xlane.f32.xlu0 %v114_v35 }
  0x37   :  { %106 = vadd.xlane.f32.xlu1 %v105_v40 }
  0x38   :  { %94 = vadd.xlane.f32.xlu0 %v93_v41  ;;  %v177_v41 = vadd.s32 4294967272, %v158_v57 }
  0x3b   :  { %130 = vadd.xlane.f32.xlu1 %v129_v46 }
  0x3c   :  { %118 = vadd.xlane.f32.xlu0 %v117_v47 }
  0xa8   :  { %v98_v48 = vpop.xlane.xlu1 %97 }
  0xa9   :  { %v86_v49 = vpop.xlane.xlu0 %85 }
  0xac   :  { %v101_v50 = vpop.xlane.xlu1 %100 }
  0xad   :  { %v89_v51 = vpop.xlane.xlu0 %88 }
  0xb0   :  { %v113_v52 = vpop.xlane.xlu1 %112 }
  0xb1   :  { %v110_v53 = vpop.xlane.xlu0 %109  ;;  %v133_v8 = vadd.f32 %v113_v52, %v89_v51  ;;  %v180_v51 = vsub.s32 %v177_v41, %v160_v60  ;;  %v485_v41 = vld [vmem:[%s850_s3] ss:$0 sm:$0xff] }
  0xb2   :  { %v132_v14 = vadd.f32 %v110_v53, %v86_v49 }
  0xb3   :  { %v141_v46 = vmul.f32 0.00390625, %v133_v8  ;;  %v148_v8 = vld [vmem:[%s849_s2] sm:$0xf] }
  0xb4   :  { %v125_v55 = vpop.xlane.xlu1 %124  ;;  %v140_v47 = vmul.f32 0.00390625, %v132_v14 }
  0xb5   :  { %v122_v56 = vpop.xlane.xlu0 %121  ;;  %v137_v63 = vadd.f32 %v125_v55, %v101_v50 }
  0xb6   :  { %v136_v2 = vadd.f32 %v122_v56, %v98_v48  ;;  %v167_v56 = vrot.slane %v141_v46, %v166_v23 }
  0xb7   :  { %v145_v34 = vmul.f32 0.00390625, %v137_v63 }
  0xb8   :  { %v104_v58 = vpop.xlane.xlu1 %103  ;;  %v144_v35 = vmul.f32 0.00390625, %v136_v2 }
  0xb9   :  { %v92_v59 = vpop.xlane.xlu0 %91  ;;  %v191_v55 = vrot.slane %v145_v34, %v166_v23 }
  0xba   :  { %v187_v49 = vrot.slane %v144_v35, %v749_v31 }
  0xbc   :  { %v128_v62 = vpop.xlane.xlu1 %127  ;;  %v192_v2 = vsel %vm168_vm0, %v191_v55, %v187_v49  ;;  %v233_v49 = vld [vmem:[%s851_s4 + $0x8] sm:$0xff] }
  0xbd   :  { %v116_v5 = vpop.xlane.xlu0 %115  ;;  %v138_v19 = vadd.f32 %v128_v62, %v104_v58  ;;  %v162_v58 = vrot.slane %v140_v47, %v749_v31 }
  0xbe   :  { %v134_v22 = vadd.f32 %v116_v5, %v92_v59 }
  0xbf   :  { %v146_v37 = vmul.f32 0.00390625, %v138_v19  ;;  %v169_v60 = vsel %vm168_vm0, %v167_v56, %v162_v58 }
  0xc0   :  { %v107_v28 = vpop.xlane.xlu1 %106  ;;  %v142_v50 = vmul.f32 0.00390625, %v134_v22 }
  0xc1   :  { %v95_v40 = vpop.xlane.xlu0 %94  ;;  %v196_v59 = vrot.slane %v146_v37, %v173_v54 }
  0xc2   :  { %v174_v62 = vrot.slane %v142_v50, %v173_v54 }
  0xc3   :  { %v197_v16 = vsel %vm175_vm1, %v196_v59, %v192_v2  ;;  %v235_v2 = vld [vmem:[%s851_s4 + $0x18] sm:$0xff] }
  0xc4   :  { %v131_v48 = vpop.xlane.xlu1 %130  ;;  %v176_v22 = vsel %vm175_vm1, %v174_v62, %v169_v60 }
  0xc5   :  { %v139_v52 = vadd.f32 %v131_v48, %v107_v28  ;;  %v119_v53 = vpop.xlane.xlu0 %118 }
  0xc6   :  { %v135_v61 = vadd.f32 %v119_v53, %v95_v40  ;;  %v604_v40 = vmov 0   ;;  %v234_v53 = vld [vmem:[%s851_s4 + $0x10] sm:$0xff] }
  0xc7   :  { %v147_v57 = vmul.f32 0.00390625, %v139_v52  ;;  %500 = vset.pattern.permute.xlu1 %v604_v40  ;;  %501 = vset.pattern.permute.xlu0 %v604_v40 }
  0xc8   :  { %v143_v63 = vmul.f32 0.00390625, %v135_v61 }
  0xc9   :  { %v201_v5 = vrot.slane %v147_v57, %v180_v51 }
  0xca   :  { %v181_v14 = vrot.slane %v143_v63, %v180_v51  ;;  %v232_v51 = vld [vmem:[%s851_s4] sm:$0xff] }
  0xcb   :  { %v202_v19 = vsel %vm182_vm2, %v201_v5, %v197_v16 }
  0xcc   :  { %v212_v37 = vmul.f32 %v202_v19, %v148_v8  ;;  %v183_v23 = vsel %vm182_vm2, %v181_v14, %v176_v22 }
  0xcd   :  { %v211_v28 = vmul.f32 %v183_v23, %v148_v8 }
  0xce   :  { %v217_v34 = vsel %vm213_vm3, %v212_v37, 0.0 }
  0xcf   :  { %218 = vadd.xlane.f32.xlu1 %v217_v34  ;;  %v214_v35 = vsel %vm213_vm3, %v211_v28, 0.0  ;;  %v304_v34 = vld [vmem:[%s852_s5 + $0x8] sm:$0xff] }
  0xd0   :  { %215 = vadd.xlane.f32.xlu0 %v214_v35  ;;  %v303_v35 = vld [vmem:[%s852_s5] sm:$0xff] }
  0xe6   :  { %227 = vbcast.lane.b32.xlu0 %v485_v41, 256 }
 0x158   :  { %v219_v50 = vpop.xlane.xlu1 %218 }
 0x159   :  { %v216_v46 = vpop.xlane.xlu0 %215 }
 0x15d   :  { %v228_v47 = vpop.permute.xlu0 %227 }
 0x15e   :  { %v230_v54 = vadd.f32 %v228_v47, %v216_v46  ;;  %v231_v48 = vadd.f32 %v228_v47, %v219_v50 }
 0x160   :  { %239 = vperm.xlu1 %500, %v230_v54   ;;  %v305_v54 = vld [vmem:[%s852_s5 + $0x10] sm:$0xff] }
 0x164   :  { %242 = vperm.xlu1 %500, %v231_v48  }
 0x1db   :  { %v240_v55 = vpop.permute.xlu1 %239 }
 0x1dc   :  { %v247_v52 = vrot.slane %v240_v55, %v749_v31 }
 0x1de   :  { %v271_v56 = vmul.f32 %v247_v52, %v233_v49  ;;  %v270_v58 = vmul.f32 %v247_v52, %v232_v51  ;;  %v272_v63 = vmul.f32 %v247_v52, %v234_v53  ;;  %v273_v14 = vmul.f32 %v247_v52, %v235_v2 }
 0x1df   :  { %v243_v59 = vpop.permute.xlu1 %242 }
 0x1e0   :  { %v251_v61 = vrot.slane %v243_v59, %v749_v31  ;;  %v282_v62 = vsel %vm278_vm4, %v271_v56, 0.0  ;;  %v279_v57 = vsel %vm278_vm4, %v270_v58, 0.0  ;;  %v285_v8 = vsel %vm278_vm4, %v272_v63, 0.0 }
 0x1e1   :  { %283 = vadd.xlane.f32.xlu0 %v282_v62  ;;  %280 = vadd.xlane.f32.xlu1 %v279_v57  ;;  %v288_v31 = vsel %vm278_vm4, %v273_v14, 0.0 }
 0x1e2   :  { %v274_v5 = vmul.f32 %v251_v61, %v232_v51  ;;  %v276_v16 = vmul.f32 %v251_v61, %v234_v53  ;;  %v275_v22 = vmul.f32 %v251_v61, %v233_v49  ;;  %v277_v23 = vmul.f32 %v251_v61, %v235_v2  ;;  %v306_v53 = vld [vmem:[%s852_s5 + $0x18] sm:$0xff]  ;;  %s605_s5 = smov [#allocation7]  }
 0x1e3   :  { %s472_s26 = sshll.u32 %s605_s5, 4  ;;  %s473_s26 = int_to_ptr.vmem [resolvable:$true] %s472_s26 }
 0x1e4   :  { %v291_v60 = vsel %vm278_vm4, %v274_v5, 0.0  ;;  %v297_v19 = vsel %vm278_vm4, %v276_v16, 0.0  ;;  %v294_v37 = vsel %vm278_vm4, %v275_v22, 0.0  ;;  %v300_v28 = vsel %vm278_vm4, %v277_v23, 0.0  ;;  %s574_s27 = scalar_lea.vmem %s473_s26, 2048  ;;  %p579_p11 = scmp.lt.s32.totalorder %s473_s26, %s473_s26 }
 0x1e5   :  { %286 = vadd.xlane.f32.xlu0 %v285_v8  ;;  %292 = vadd.xlane.f32.xlu1 %v291_v60  ;;  %p575_p10 = scmp.ne.s32.totalorder %s473_s26, %s574_s27  ;;  %p580_p12 = scmp.lt.s32.totalorder %s574_s27, %s574_s27 }
 0x1e7   :  { %p581_p13 = por %p580_p12, %p579_p11 }
 0x1e9   :  { %289 = vadd.xlane.f32.xlu0 %v288_v31  ;;  %298 = vadd.xlane.f32.xlu1 %v297_v19  ;;  %p582_p0 = pnand %p581_p13, %p575_p10 }
 0x1ed   :  { %295 = vadd.xlane.f32.xlu0 %v294_v37 }
 0x1f1   :  { %301 = vadd.xlane.f32.xlu0 %v300_v28 }
 0x26a   :  { %v284_v40 = vpop.xlane.xlu0 %283  ;;  %v281_v41 = vpop.xlane.xlu1 %280 }
 0x26b   :  { %v308_v46 = vadd.f32 %v304_v34, %v284_v40  ;;  %v307_v47 = vadd.f32 %v303_v35, %v281_v41 }
 0x26d   :  { %v487_v50 = vmul.f32 -1.442695, %v308_v46  ;;  %v486_v48 = vmul.f32 -1.442695, %v307_v47 }
 0x26e   :  { %v287_v55 = vpop.xlane.xlu0 %286  ;;  %v293_v49 = vpop.xlane.xlu1 %292 }
 0x26f   :  { %502 = vpow2.f32 %v487_v50  ;;  %v309_v51 = vadd.f32 %v305_v54, %v287_v55  ;;  %v311_v52 = vadd.f32 %v303_v35, %v293_v49 }
 0x270   :  { %504 = vpow2.f32 %v486_v48 }
 0x271   :  { %v488_v56 = vmul.f32 -1.442695, %v309_v51  ;;  %v490_v62 = vmul.f32 -1.442695, %v311_v52 }
 0x272   :  { %v290_v58 = vpop.xlane.xlu0 %289  ;;  %v299_v61 = vpop.xlane.xlu1 %298 }
 0x273   :  { %506 = vpow2.f32 %v488_v56  ;;  %v310_v59 = vadd.f32 %v306_v53, %v290_v58  ;;  %v313_v63 = vadd.f32 %v305_v54, %v299_v61 }
 0x275   :  { %v489_v57 = vmul.f32 -1.442695, %v310_v59  ;;  %v492_v60 = vmul.f32 -1.442695, %v313_v63  ;;  %v366_v63 = vsub.f32 %v673_v10, %v683_v15 }
 0x276   :  { %v296_v2 = vpop.xlane.xlu0 %295 }
 0x277   :  { %508 = vpow2.f32 %v489_v57  ;;  %v312_v5 = vadd.f32 %v304_v34, %v296_v2  ;;  %v365_v57 = vsub.f32 %v671_v9, %v675_v11  ;;  %v363_v2 = vsub.f32 %v659_v3, %v677_v12 }
 0x278   :  { %510 = vpow2.f32 %v490_v62 }
 0x279   :  { %v491_v8 = vmul.f32 -1.442695, %v312_v5  ;;  %v364_v5 = vsub.f32 %v661_v4, %v679_v13 }
 0x27a   :  { %v302_v14 = vpop.xlane.xlu0 %301 }
 0x27b   :  { %512 = vpow2.f32 %v491_v8  ;;  %v314_v31 = vadd.f32 %v306_v53, %v302_v14 }
 0x27c   :  { %v503_v16 = vpop.eup %502  ;;  %514 = vpow2.f32 %v492_v60 }
 0x27d   :  { %v505_v19 = vpop.eup %504  ;;  %v340_v22 = vadd.f32 1.0, %v503_v16  ;;  %v493_v28 = vmul.f32 -1.442695, %v314_v31  ;;  %v367_v31 = vsub.f32 %v705_v26, %v717_v32  ;;  %v370_v26 = vsub.f32 %v731_v39, %v743_v45 }
 0x27e   :  { %v339_v37 = vadd.f32 1.0, %v505_v19  ;;  %v368_v19 = vsub.f32 %v707_v27, %v719_v33 }
 0x27f   :  { %516 = vrcp.f32 %v340_v22 }
 0x280   :  { %v507_v23 = vpop.eup %506  ;;  %518 = vrcp.f32 %v339_v37 }
 0x281   :  { %v341_v35 = vadd.f32 1.0, %v507_v23 }
 0x283   :  { %520 = vrcp.f32 %v341_v35 }
 0x284   :  { %v509_v40 = vpop.eup %508  ;;  %522 = vpow2.f32 %v493_v28  ;;  %v369_v28 = vsub.f32 %v729_v38, %v741_v44 }
 0x285   :  { %v511_v34 = vpop.eup %510  ;;  %v342_v41 = vadd.f32 1.0, %v509_v40  ;;  %v372_v40 = vsub.f32 %v655_v1, %v695_v21 }
 0x286   :  { %v343_v46 = vadd.f32 1.0, %v511_v34 }
 0x287   :  { %524 = vrcp.f32 %v342_v41 }
 0x288   :  { %v513_v47 = vpop.eup %512  ;;  %526 = vrcp.f32 %v343_v46 }
 0x289   :  { %v515_v54 = vpop.eup %514  ;;  %v344_v48 = vadd.f32 1.0, %v513_v47 }
 0x28a   :  { %v345_v51 = vadd.f32 1.0, %v515_v54 }
 0x28b   :  { %528 = vrcp.f32 %v344_v48 }
 0x28c   :  { %v517_v50 = vpop.eup %516  ;;  %530 = vrcp.f32 %v345_v51  ;;  %v377_v51 = vsub.f32 %v725_v36, %v737_v42 }
 0x28d   :  { %v519_v55 = vpop.eup %518  ;;  %386 = vperm.xlu0 %501, %v517_v50  }
 0x28e   :  { %381 = vperm.xlu1 %500, %v519_v55  }
 0x290   :  { %v521_v49 = vpop.eup %520 }
 0x291   :  { %v523_v52 = vpop.eup %522 }
 0x292   :  { %391 = vperm.xlu1 %500, %v521_v49   ;;  %v346_v56 = vadd.f32 1.0, %v523_v52 }
 0x294   :  { %v525_v53 = vpop.eup %524  ;;  %532 = vrcp.f32 %v346_v56 }
 0x295   :  { %v527_v58 = vpop.eup %526 }
 0x296   :  { %396 = vperm.xlu1 %500, %v525_v53  }
 0x298   :  { %v529_v59 = vpop.eup %528 }
 0x299   :  { %v531_v61 = vpop.eup %530 }
 0x29a   :  { %401 = vperm.xlu1 %500, %v527_v58  }
 0x29e   :  { %406 = vperm.xlu1 %500, %v529_v59  }
 0x2a1   :  { %v533_v62 = vpop.eup %532 }
 0x2a2   :  { %411 = vperm.xlu1 %500, %v531_v61  }
 0x2a6   :  { %416 = vperm.xlu1 %500, %v533_v62  }
 0x308   :  { %v387_v8 = vpop.permute.xlu0 %386 }
 0x309   :  { %v421_v60 = vmul.f32 %v387_v8, %v365_v57  ;;  %v422_v14 = vmul.f32 %v387_v8, %v366_v63  ;;  %v382_v16 = vpop.permute.xlu1 %381 }
 0x30a   :  { %v419_v9 = vmul.f32 %v382_v16, %v363_v2  ;;  %v420_v22 = vmul.f32 %v382_v16, %v364_v5 }
 0x30b   :  { %v437_v10 = vadd.f32 %v421_v60, %v675_v11  ;;  %v438_v37 = vadd.f32 %v422_v14, %v683_v15 }
 0x30c   :  { %v435_v3 = vadd.f32 %v419_v9, %v677_v12  ;;  %v436_v4 = vadd.f32 %v420_v22, %v679_v13  ;;  %v371_v13 = vsub.f32 %v653_v0, %v693_v20 }
 0x30d   :  { %453 = vst [vmem:[#allocation7 + $0x10] sm:$0xff] %v437_v10  ;;  %454 = vst [vmem:[#allocation7 + $0x18] sm:$0xff] %v438_v37  ;;  %v392_v23 = vpop.permute.xlu1 %391 }
 0x30e   :  { %451 = vst [vmem:[#allocation7] sm:$0xff] %v435_v3  ;;  %452 = vst [vmem:[#allocation7 + $0x8] sm:$0xff] %v436_v4  ;;  %v423_v27 = vmul.f32 %v392_v23, %v367_v31  ;;  %v424_v35 = vmul.f32 %v392_v23, %v368_v19 }
 0x310   :  { %v439_v11 = vadd.f32 %v423_v27, %v717_v32  ;;  %v440_v15 = vadd.f32 %v424_v35, %v719_v33  ;;  %v373_v32 = vsub.f32 %v665_v6, %v687_v17  ;;  %v374_v33 = vsub.f32 %v667_v7, %v689_v18 }
 0x311   :  { %v397_v12 = vpop.permute.xlu1 %396 }
 0x312   :  { %455 = vst [vmem:[#allocation7 + $0x20] sm:$0xff] %v439_v11  ;;  %456 = vst [vmem:[#allocation7 + $0x28] sm:$0xff] %v440_v15  ;;  %v425_v38 = vmul.f32 %v397_v12, %v369_v28  ;;  %v426_v34 = vmul.f32 %v397_v12, %v370_v26 }
 0x314   :  { %v441_v39 = vadd.f32 %v425_v38, %v741_v44  ;;  %v442_v41 = vadd.f32 %v426_v34, %v743_v45  ;;  %v375_v44 = vsub.f32 %v701_v24, %v711_v29  ;;  %v376_v45 = vsub.f32 %v703_v25, %v713_v30  ;;  %v856_v24 = vld [vmem:[#allocation11_spill] sm:$0xff] }
 0x315   :  { %v402_v46 = vpop.permute.xlu1 %401  ;;  %v378_v52 = vsub.f32 %v856_v24, %v739_v43 }
 0x316   :  { %457 = vst [vmem:[#allocation7 + $0x30] sm:$0xff] %v441_v39  ;;  %458 = vst [vmem:[#allocation7 + $0x38] sm:$0xff] %v442_v41  ;;  %v427_v0 = vmul.f32 %v402_v46, %v371_v13  ;;  %v428_v47 = vmul.f32 %v402_v46, %v372_v40 }
 0x318   :  { %v443_v1 = vadd.f32 %v427_v0, %v693_v20  ;;  %v444_v54 = vadd.f32 %v428_v47, %v695_v21 }
 0x319   :  { %v407_v50 = vpop.permute.xlu1 %406 }
 0x31a   :  { %459 = vst [vmem:[#allocation7 + $0x40] sm:$0xff] %v443_v1  ;;  %460 = vst [vmem:[#allocation7 + $0x48] sm:$0xff] %v444_v54  ;;  %v429_v6 = vmul.f32 %v407_v50, %v373_v32  ;;  %v430_v48 = vmul.f32 %v407_v50, %v374_v33 }
 0x31c   :  { %v445_v7 = vadd.f32 %v429_v6, %v687_v17  ;;  %v446_v55 = vadd.f32 %v430_v48, %v689_v18 }
 0x31d   :  { %v412_v49 = vpop.permute.xlu1 %411 }
 0x31e   :  { %461 = vst [vmem:[#allocation7 + $0x50] sm:$0xff] %v445_v7  ;;  %462 = vst [vmem:[#allocation7 + $0x58] sm:$0xff] %v446_v55  ;;  %v431_v20 = vmul.f32 %v412_v49, %v375_v44  ;;  %v432_v21 = vmul.f32 %v412_v49, %v376_v45 }
 0x320   :  { %v447_v25 = vadd.f32 %v431_v20, %v711_v29  ;;  %v448_v53 = vadd.f32 %v432_v21, %v713_v30 }
 0x321   :  { %v417_v56 = vpop.permute.xlu1 %416 }
 0x322   :  { %463 = vst [vmem:[#allocation7 + $0x60] sm:$0xff] %v447_v25  ;;  %464 = vst [vmem:[#allocation7 + $0x68] sm:$0xff] %v448_v53  ;;  %v433_v17 = vmul.f32 %v417_v56, %v377_v51  ;;  %v434_v18 = vmul.f32 %v417_v56, %v378_v52 }
 0x324   :  { %v449_v58 = vadd.f32 %v433_v17, %v737_v42  ;;  %v450_v59 = vadd.f32 %v434_v18, %v739_v43 }
 0x326   :  { %465 = vst [vmem:[#allocation7 + $0x70] sm:$0xff] %v449_v58  ;;  %466 = vst [vmem:[#allocation7 + $0x78] sm:$0xff] %v450_v59 }
 0x327   :  { %585 = shalt.err (!%p582_p0)
}
 0x328   :  { %478 = dma.vmem_to_hbm [thread:$0]  %s473_s26, 2048, %s853_s6, [#allocation4], %s601_s24, %s601_s24, %s602_s25  }
 0x329   :  { %598 = dma.done.wait [#allocation4], 2048  }
 0x32a   :  { %599 = vsyncadd [#allocation4], 4294965248 }
 0x32b   :  { %482 = vsyncpa [#allocation3], 1 }
 0x32c   :  { %483 = vsyncpa [#allocation6], 1 }
 0x32d   :  { %484 = vsyncpa [#allocation4], 1 }

</bundles_post_ra>
